<compile_context>
chip_gen: v7x
topology: tpu7x:2x2x1
jax: 0.10.0
libtpu: 0.0.40
codegen_flags: <defaults>
</compile_context>

<pallas_src>
import jax
import jax.numpy as jnp
from jax.experimental import pallas as pl
from jax.experimental.pallas import tpu as pltpu


def _round_up(n, m):
    return ((n + m - 1) // m) * m


def _bytes(a):
    return int(a.size) * a.dtype.itemsize


def _vmem_capacity_bytes():
    """Generation-aware physical VMEM capacity (v5e/v6e: 128 MiB, v7x: 64 MiB)."""
    try:
        return int(pltpu.get_tpu_info().vmem_capacity_bytes)
    except Exception:
        return 64 * 1024 * 1024  # conservative (v7x-sized) fallback


# --------------------------------------------------------------------------
# Kernels
# --------------------------------------------------------------------------
def _ffn_kernel_resident(x_ref, w1_ref, b1_ref, w2_ref, b2_ref, o_ref):
    # x_ref : (tm, d_in)            pipelined row tile (already in weight dtype)
    # w1_ref: (d_in, hidden_pad)    resident in VMEM (not double-buffered)
    # b1_ref: (1, hidden_pad)       f32
    # w2_ref: (hidden_pad, out_pad) resident in VMEM
    # b2_ref: (1, out_pad)          f32
    # o_ref : (tm, out_pad)         f32, lane-dense
    h = jnp.dot(x_ref[...], w1_ref[...], preferred_element_type=jnp.float32)
    h = jnp.maximum(h + b1_ref[...], 0.0)            # bias + ReLU in f32 (VPU)
    # dropout (eval mode) == identity
    y = jnp.dot(h.astype(w2_ref.dtype), w2_ref[...],
                preferred_element_type=jnp.float32) + b2_ref[...]
    o_ref[...] = y.astype(o_ref.dtype)


def _ffn_kernel_ktiled(x_ref, w1_ref, b1_ref, w2_ref, b2_ref, o_ref, acc_ref):
    # Hidden-dim tiled path. Grid = (row blocks, hidden blocks["arbitrary"]).
    # x_ref : (tm, d_in); w1_ref: (d_in, tk); b1_ref: (1, tk)
    # w2_ref: (tk, out_pad); b2_ref: (1, out_pad)
    # o_ref : (tm, out_pad) f32; acc_ref: (tm, out_pad) f32 scratch
    k = pl.program_id(1)

    @pl.when(k == 0)
    def _():
        acc_ref[...] = jnp.zeros_like(acc_ref)

    h = jnp.dot(x_ref[...], w1_ref[...], preferred_element_type=jnp.float32)
    h = jnp.maximum(h + b1_ref[...], 0.0)            # ReLU per hidden chunk
    acc_ref[...] += jnp.dot(h.astype(w2_ref.dtype), w2_ref[...],
                            preferred_element_type=jnp.float32)

    @pl.when(k == pl.num_programs(1) - 1)
    def _():
        o_ref[...] = (acc_ref[...] + b2_ref[...]).astype(o_ref.dtype)


# --------------------------------------------------------------------------
# One-time parameter repack (init-time, NOT per call)
# --------------------------------------------------------------------------
def prepare_ffn_params(w1, b1, w2, b2, *, param_dtype=jnp.float32, lane=128):
    """Repack PyTorch-layout params into kernel layout.

    w1: (hidden, d_in), b1: (hidden,), w2: (out_dim, hidden), b2: (out_dim,).
    Returns: w1 (d_in, hidden_pad), b1 (1, hidden_pad) f32,
             w2 (hidden_pad, out_pad), b2 (1, out_pad) f32,
    with hidden_pad/out_pad rounded up to 128 lanes (zero padding is inert).
    """
    hidden, d_in = w1.shape
    out_dim = w2.shape[0]
    hidden_pad = _round_up(hidden, lane)
    out_pad = _round_up(out_dim, lane)

    w1_t = jnp.zeros((d_in, hidden_pad), param_dtype)
    w1_t = w1_t.at[:, :hidden].set(jnp.asarray(w1, param_dtype).T)
    b1_r = jnp.zeros((1, hidden_pad), jnp.float32)
    b1_r = b1_r.at[:, :hidden].set(jnp.asarray(b1, jnp.float32))

    w2_t = jnp.zeros((hidden_pad, out_pad), param_dtype)
    w2_t = w2_t.at[:hidden, :out_dim].set(jnp.asarray(w2, param_dtype).T)
    b2_r = jnp.zeros((1, out_pad), jnp.float32)
    b2_r = b2_r.at[:, :out_dim].set(jnp.asarray(b2, jnp.float32))

    return {"w1": w1_t, "b1": b1_r, "w2": w2_t, "b2": b2_r, "out_dim": out_dim}


# --------------------------------------------------------------------------
# Forward wrapper
# --------------------------------------------------------------------------
def ffn_classifier_fwd(x, params, *, tm=None, out_dtype=jnp.float32,
                       force_k_tiling=False):
    """Fused FFN forward. x: (..., input_dim) -> (..., output_dim) in out_dtype."""
    w1, b1, w2, b2 = params["w1"], params["b1"], params["w2"], params["b2"]
    out_dim = params["out_dim"]
    d_in, hidden_pad = w1.shape
    out_pad = w2.shape[1]

    lead_shape = x.shape[:-1]
    # Stream x in the weight dtype (bf16 halves the dominant HBM read and
    # removes the per-tile cast from the kernel). No per-call padding of x.
    x2 = x.reshape(-1, d_in).astype(w1.dtype)
    n_rows = x2.shape[0]
    in_bytes = x2.dtype.itemsize
    w_bytes_e = w1.dtype.itemsize

    vmem_cap = _vmem_capacity_bytes()
    vmem_budget = (3 * vmem_cap) // 4            # headroom for the scheduler
    weight_bytes = _bytes(w1) + _bytes(b1) + _bytes(w2) + _bytes(b2)

    # Largest row tile that never exceeds the array (ragged tail is masked).
    tm_rows = max(8, (n_rows // 8) * 8)

    def per_row_resident(hidden_chunk):
        return (2 * d_in * in_bytes              # x tile (double-buffered)
                + 2 * out_pad * 4                # f32 out tile (double-buffered)
                + hidden_chunk * 4               # f32 hidden intermediate
                + out_pad * 4)                   # f32 result before store

    # Resident path only when all repacked weights plus a modest row tile fit.
    min_rows = min(tm_rows, 128)
    resident_ok = weight_bytes + min_rows * per_row_resident(hidden_pad) <= vmem_budget
    use_ktile = force_k_tiling or not resident_ok

    cost = pl.CostEstimate(
        flops=2 * n_rows * d_in * hidden_pad + 2 * n_rows * hidden_pad * out_pad,
        transcendentals=0,
        bytes_accessed=_bytes(x2) + weight_bytes + n_rows * out_pad * 4,
    )

    if not use_ktile:
        # ----------------- resident-weights path -----------------
        if tm is None:
            tm_fit = (vmem_budget - weight_bytes) // max(per_row_resident(hidden_pad), 1)
            tm_fit = max(8, (int(tm_fit) // 8) * 8)
            tm = min(1024, tm_rows, tm_fit)
        tm = max(8, (tm // 8) * 8)

        grid = (pl.cdiv(n_rows, tm),)
        in_specs = [
            pl.BlockSpec((tm, d_in), lambda i: (i, 0)),      # pipelined x tile
            pl.BlockSpec(memory_space=pltpu.MemorySpace.VMEM),  # w1 resident
            pl.BlockSpec(memory_space=pltpu.MemorySpace.VMEM),  # b1
            pl.BlockSpec(memory_space=pltpu.MemorySpace.VMEM),  # w2 resident
            pl.BlockSpec(memory_space=pltpu.MemorySpace.VMEM),  # b2
        ]
        out_specs = pl.BlockSpec((tm, out_pad), lambda i: (i, 0))
        scratch_shapes = []
        kernel = _ffn_kernel_resident
        dim_sem = ("parallel",)
        est = weight_bytes + tm * per_row_resident(hidden_pad)
    else:
        # ----------------- hidden-dim (K) tiled path -----------------
        # Largest multiple of 128 <= 1024 that divides hidden_pad.
        tk = 128
        for cand in range(128, min(hidden_pad, 1024) + 1, 128):
            if hidden_pad % cand == 0:
                tk = cand

        def per_row_ktile():
            return (2 * d_in * in_bytes + 2 * out_pad * 4
                    + tk * 4                      # f32 hidden chunk
                    + 2 * out_pad * 4)            # f32 acc scratch + result

        ktile_fixed = (2 * (d_in * tk + tk * out_pad) * w_bytes_e
                       + 2 * (tk + out_pad) * 4)
        if tm is None:
            tm_fit = (vmem_budget - ktile_fixed) // max(per_row_ktile(), 1)
            tm_fit = max(8, (int(tm_fit) // 8) * 8)
            tm = min(1024, tm_rows, tm_fit)
        tm = max(8, (tm // 8) * 8)

        grid = (pl.cdiv(n_rows, tm), hidden_pad // tk)
        in_specs = [
            pl.BlockSpec((tm, d_in), lambda i, k: (i, 0)),
            pl.BlockSpec((d_in, tk), lambda i, k: (0, k)),
            pl.BlockSpec((1, tk), lambda i, k: (0, k)),
            pl.BlockSpec((tk, out_pad), lambda i, k: (k, 0)),
            pl.BlockSpec((1, out_pad), lambda i, k: (0, 0)),
        ]
        out_specs = pl.BlockSpec((tm, out_pad), lambda i, k: (i, 0))
        scratch_shapes = [pltpu.VMEM((tm, out_pad), jnp.float32)]
        kernel = _ffn_kernel_ktiled
        dim_sem = ("parallel", "arbitrary")
        est = ktile_fixed + tm * per_row_ktile()

    vmem_limit = int(min(vmem_cap - (4 << 20), max(16 << 20, 2 * est)))

    out = pl.pallas_call(
        kernel,
        out_shape=jax.ShapeDtypeStruct((n_rows, out_pad), out_dtype),
        grid_spec=pltpu.PrefetchScalarGridSpec(
            num_scalar_prefetch=0,
            grid=grid,
            in_specs=in_specs,
            out_specs=out_specs,
            scratch_shapes=scratch_shapes,
        ),
        compiler_params=pltpu.CompilerParams(
            dimension_semantics=dim_sem,
            vmem_limit_bytes=vmem_limit,
        ),
        cost_estimate=cost,
    )(x2, w1, b1, w2, b2)

    return out[:, :out_dim].reshape(*lead_shape, out_dim)


# --------------------------------------------------------------------------
# Demo / self-test
# --------------------------------------------------------------------------
if __name__ == "__main__":
    batch, seq = 2, 8
    input_dim, hidden_dim, output_dim = 32, 64, 16
    dropout_prob = 0.1  # inference mode -> unused

    key = jax.random.PRNGKey(0)
    kx, k1, k2, k3, k4 = jax.random.split(key, 5)

    x = jax.random.normal(kx, (batch, seq, input_dim), dtype=jnp.float32)

    # Deterministic init (roughly nn.Linear scale), PyTorch layout:
    # w (out_features, in_features), b (out_features,).
    bound1 = 1.0 / (input_dim ** 0.5)
    bound2 = 1.0 / (hidden_dim ** 0.5)
    w1 = jax.random.uniform(k1, (hidden_dim, input_dim), jnp.float32, -bound1, bound1)
    b1 = jax.random.uniform(k2, (hidden_dim,), jnp.float32, -bound1, bound1)
    w2 = jax.random.uniform(k3, (output_dim, hidden_dim), jnp.float32, -bound2, bound2)
    b2 = jax.random.uniform(k4, (output_dim,), jnp.float32, -bound2, bound2)

    # Plain-JAX reference (eval-mode dropout == identity).
    x_flat = x.reshape(batch * seq, input_dim)
    ref = (jnp.maximum(x_flat @ w1.T + b1, 0.0) @ w2.T + b2)
    ref = ref.reshape(batch, seq, output_dim)

    # 1) f32 params, resident-weights path (bit-faithful to PyTorch forward).
    params_f32 = prepare_ffn_params(w1, b1, w2, b2, param_dtype=jnp.float32)
    out_f32 = ffn_classifier_fwd(x, params_f32)
    jax.block_until_ready(out_f32)
    assert out_f32.shape == (batch, seq, output_dim)
    assert out_f32.dtype == jnp.float32
    assert jnp.allclose(out_f32, ref, atol=1e-5, rtol=1e-5), "f32 resident path mismatch"

    # 2) Forced hidden-dim (K) tiled path — exercises the large-weight fallback.
    out_kt = ffn_classifier_fwd(x, params_f32, force_k_tiling=True)
    jax.block_until_ready(out_kt)
    assert jnp.allclose(out_kt, ref, atol=1e-5, rtol=1e-5), "K-tiled path mismatch"

    # 3) Ragged row count (3*5 = 15 rows, not a multiple of the row tile):
    #    exercises the masked last row block (no per-call padding of x).
    x_rag = jax.random.normal(kx, (3, 5, input_dim), dtype=jnp.float32)
    ref_rag = (jnp.maximum(x_rag.reshape(15, input_dim) @ w1.T + b1, 0.0) @ w2.T + b2
               ).reshape(3, 5, output_dim)
    out_rag = ffn_classifier_fwd(x_rag, params_f32)
    jax.block_until_ready(out_rag)
    assert out_rag.shape == (3, 5, output_dim)
    assert jnp.allclose(out_rag, ref_rag, atol=1e-5, rtol=1e-5), "ragged tail mismatch"

    # 4) bf16 weights + bf16 activation stream (f32 MXU accumulation, f32 logits).
    params_bf16 = prepare_ffn_params(w1, b1, w2, b2, param_dtype=jnp.bfloat16)
    out_bf16 = ffn_classifier_fwd(x.astype(jnp.bfloat16), params_bf16)
    jax.block_until_ready(out_bf16)
    assert out_bf16.dtype == jnp.float32
    assert jnp.allclose(out_bf16, ref, atol=7.5e-2, rtol=5e-2), "bf16 mismatch vs reference"

    print("KERNEL_OK")
</pallas_src>

<mosaic_0001>
module attributes {stable_mosaic.version = 11 : i64} {
  func.func @_ffn_kernel_resident(%arg0: i32, %arg1: memref<16x32xf32, #tpu.memory_space<vmem>>, %arg2: memref<32x128xf32, #tpu.memory_space<vmem>>, %arg3: memref<1x128xf32, #tpu.memory_space<vmem>>, %arg4: memref<128x128xf32, #tpu.memory_space<vmem>>, %arg5: memref<1x128xf32, #tpu.memory_space<vmem>>, %arg6: memref<16x128xf32, #tpu.memory_space<vmem>>) attributes {dimension_semantics = [#tpu.dimension_semantics<parallel>], iteration_bounds = array<i64: 1>, scalar_prefetch = 0 : i64, scratch_operands = 0 : i64, tpu.core_type = #tpu.core_type<tc>, window_params = [{transform_indices = @transform_0, window_bounds = array<i64: 16, 32>}, {pipeline_mode = #tpu.pipeline_mode<synchronous>, transform_indices = @transform_1, window_bounds = array<i64: 32, 128>}, {pipeline_mode = #tpu.pipeline_mode<synchronous>, transform_indices = @transform_2, window_bounds = array<i64: 1, 128>}, {pipeline_mode = #tpu.pipeline_mode<synchronous>, transform_indices = @transform_3, window_bounds = array<i64: 128, 128>}, {pipeline_mode = #tpu.pipeline_mode<synchronous>, transform_indices = @transform_4, window_bounds = array<i64: 1, 128>}, {transform_indices = @transform_5, window_bounds = array<i64: 16, 128>}]} {
    %c0 = arith.constant 0 : index
    %c0_0 = arith.constant 0 : index
    %0 = vector.load %arg1[%c0, %c0_0] : memref<16x32xf32, #tpu.memory_space<vmem>>, vector<16x32xf32>
    %c0_1 = arith.constant 0 : index
    %c0_2 = arith.constant 0 : index
    %1 = vector.load %arg2[%c0_1, %c0_2] : memref<32x128xf32, #tpu.memory_space<vmem>>, vector<32x128xf32>
    %cst = arith.constant dense<0.000000e+00> : vector<16x128xf32>
    %2 = tpu.matmul %0, %1, %cst {dimension_numbers = #tpu.dot_dimension_numbers<[1], [0], [0], [1], [0, 0, 1, 1], [], []>} : vector<16x32xf32>, vector<32x128xf32>, vector<16x128xf32> -> vector<16x128xf32>
    %c0_3 = arith.constant 0 : index
    %c0_4 = arith.constant 0 : index
    %3 = vector.load %arg3[%c0_3, %c0_4] : memref<1x128xf32, #tpu.memory_space<vmem>>, vector<1x128xf32>
    %4 = vector.broadcast %3 : vector<1x128xf32> to vector<16x128xf32>
    %5 = arith.addf %2, %4 : vector<16x128xf32>
    %cst_5 = arith.constant 0.000000e+00 : f32
    %6 = vector.broadcast %cst_5 : f32 to vector<16x128xf32>
    %7 = arith.maximumf %5, %6 : vector<16x128xf32>
    %c0_6 = arith.constant 0 : index
    %c0_7 = arith.constant 0 : index
    %8 = vector.load %arg4[%c0_6, %c0_7] : memref<128x128xf32, #tpu.memory_space<vmem>>, vector<128x128xf32>
    %cst_8 = arith.constant dense<0.000000e+00> : vector<16x128xf32>
    %9 = tpu.matmul %7, %8, %cst_8 {dimension_numbers = #tpu.dot_dimension_numbers<[1], [0], [0], [1], [0, 0, 1, 1], [], []>} : vector<16x128xf32>, vector<128x128xf32>, vector<16x128xf32> -> vector<16x128xf32>
    %c0_9 = arith.constant 0 : index
    %c0_10 = arith.constant 0 : index
    %10 = vector.load %arg5[%c0_9, %c0_10] : memref<1x128xf32, #tpu.memory_space<vmem>>, vector<1x128xf32>
    %11 = vector.broadcast %10 : vector<1x128xf32> to vector<16x128xf32>
    %12 = arith.addf %9, %11 : vector<16x128xf32>
    %c0_11 = arith.constant 0 : index
    %c0_12 = arith.constant 0 : index
    %13 = vector.load %arg6[%c0_11, %c0_12] : memref<16x128xf32, #tpu.memory_space<vmem>>, vector<16x128xf32>
    tpu.vector_store %arg6[%c0_11, %c0_12], %12 {strides = array<i32>} : memref<16x128xf32, #tpu.memory_space<vmem>>, vector<16x128xf32>,
    return
  }
  func.func @transform_0(%arg0: i32) -> (i32, i32) {
    %c0_i32 = arith.constant 0 : i32
    %c0_i32_0 = arith.constant 0 : i32
    return %arg0, %c0_i32 : i32, i32
  }
  func.func @transform_1(%arg0: i32) -> (i32, i32) {
    %c0_i32 = arith.constant 0 : i32
    %c0_i32_0 = arith.constant 0 : i32
    %c0_i32_1 = arith.constant 0 : i32
    return %c0_i32, %c0_i32_0 : i32, i32
  }
  func.func @transform_2(%arg0: i32) -> (i32, i32) {
    %c0_i32 = arith.constant 0 : i32
    %c0_i32_0 = arith.constant 0 : i32
    %c0_i32_1 = arith.constant 0 : i32
    return %c0_i32, %c0_i32_0 : i32, i32
  }
  func.func @transform_3(%arg0: i32) -> (i32, i32) {
    %c0_i32 = arith.constant 0 : i32
    %c0_i32_0 = arith.constant 0 : i32
    %c0_i32_1 = arith.constant 0 : i32
    return %c0_i32, %c0_i32_0 : i32, i32
  }
  func.func @transform_4(%arg0: i32) -> (i32, i32) {
    %c0_i32 = arith.constant 0 : i32
    %c0_i32_0 = arith.constant 0 : i32
    %c0_i32_1 = arith.constant 0 : i32
    return %c0_i32, %c0_i32_0 : i32, i32
  }
  func.func @transform_5(%arg0: i32) -> (i32, i32) {
    %c0_i32 = arith.constant 0 : i32
    %c0_i32_0 = arith.constant 0 : i32
    return %arg0, %c0_i32 : i32, i32
  }
}

</mosaic_0001>

<bundles_post_ra>
// kernel: tpu_custom_call.1
= control target key start
LH: loop header
LB: loop body
LE: loop exit
PB: predicated region body
PF: predicated region fallthrough
CT: control target
= control target key end

     0   :  { %10 = vsyncpa [#allocation3], 0  ;;  %s602_s0 = inlined_call_operand.hbm [shape: f32[16,32], index: 0, kind: input, shape index: {}]   ;;  %s603_s1 = inlined_call_operand.hbm [shape: f32[32,128], index: 1, kind: input, shape index: {}]   ;;  %s604_s2 = inlined_call_operand.vmem [shape: f32[1,128], index: 2, kind: input, shape index: {}]   ;;  %s605_s3 = inlined_call_operand.hbm [shape: f32[128,128], index: 3, kind: input, shape index: {}]   ;;  %s606_s4 = inlined_call_operand.vmem [shape: f32[1,128], index: 4, kind: input, shape index: {}]   ;;  %s607_s5 = inlined_call_operand.hbm [shape: f32[16,128], index: 5, kind: output, shape index: {}]  }
   0x1   :  { %11 = vsyncpa [#allocation6], 0 }
   0x2   :  { %12 = vsyncpa [#allocation4], 0  ;;  %s491_s18 = smov [#allocation5]   ;;  %s492_s20 = smov [#allocation2]  }
   0x3   :  { %s30_s19 = sshll.u32 %s491_s18, 4  ;;  %s18_s21 = sshll.u32 %s492_s20, 4  ;;  %s31_s19 = int_to_ptr.vmem [resolvable:$true] %s30_s19  ;;  %s527_s21 = int_to_ptr.vmem [resolvable:$true] %s18_s21 }
   0x4   :  { %s397_s24 = scalar_lea.hbm %s603_s1, 512 }
   0x5   :  { %p398_p0 = scmp.ne.s32.totalorder %s603_s1, %s397_s24  ;;  %p401_p1 = scmp.lt.u32.totalorder %s397_s24, %s603_s1 }
   0x7   :  { %p403_p2 = pnand %p401_p1, %p398_p0 }
   0x9   :  { %406 = shalt.err (!%p403_p2)
}
   0xa   :  { %s407_s29 = scalar_lea.vmem %s31_s19, 512  ;;  %p412_p4 = scmp.lt.s32.totalorder %s31_s19, %s31_s19 }
   0xb   :  { %p408_p3 = scmp.ne.s32.totalorder %s31_s19, %s407_s29  ;;  %p413_p5 = scmp.lt.s32.totalorder %s407_s29, %s407_s29 }
   0xd   :  { %p414_p6 = por %p413_p5, %p412_p4 }
   0xf   :  { %p415_p7 = pnand %p414_p6, %p408_p3 }
  0x11   :  { %418 = shalt.err (!%p415_p7)
}
  0x12   :  { %s493_s30 = smov 128   ;;  %s494_s6 = smov 8  }
  0x13   :  { %36 = dma.hbm_to_vmem [thread:$0]  %s603_s1, 512, %s31_s19, [#allocation6], %s493_s30, %s493_s30, %s494_s6  }
  0x14   :  { %s419_s11 = scalar_lea.hbm %s602_s0, 256 }
  0x15   :  { %p420_p8 = scmp.ne.s32.totalorder %s602_s0, %s419_s11  ;;  %p423_p9 = scmp.lt.u32.totalorder %s419_s11, %s602_s0 }
  0x17   :  { %p425_p10 = pnand %p423_p9, %p420_p8 }
  0x19   :  { %428 = shalt.err (!%p425_p10)
}
  0x1a   :  { %s429_s16 = scalar_lea.vmem %s527_s21, 256  ;;  %p434_p12 = scmp.lt.s32.totalorder %s527_s21, %s527_s21 }
  0x1b   :  { %p430_p11 = scmp.ne.s32.totalorder %s527_s21, %s429_s16  ;;  %p435_p13 = scmp.lt.s32.totalorder %s429_s16, %s429_s16 }
  0x1d   :  { %p436_p0 = por %p435_p13, %p434_p12 }
  0x1f   :  { %p437_p1 = pnand %p436_p0, %p430_p11 }
  0x21   :  { %440 = shalt.err (!%p437_p1)
}
  0x22   :  { %24 = dma.hbm_to_vmem [thread:$0]  %s602_s0, 256, %s527_s21, [#allocation3], %s493_s30, %s493_s30, %s494_s6  }
  0x23   :  { %s495_s18 = smov [#allocation7]   ;;  %s441_s23 = scalar_lea.hbm %s605_s3, 2048 }
  0x24   :  { %s44_s19 = sshll.u32 %s495_s18, 4  ;;  %p442_p2 = scmp.ne.s32.totalorder %s605_s3, %s441_s23  ;;  %s45_s19 = int_to_ptr.vmem [resolvable:$true] %s44_s19 }
  0x25   :  { %p445_p3 = scmp.lt.u32.totalorder %s441_s23, %s605_s3 }
  0x27   :  { %p447_p4 = pnand %p445_p3, %p442_p2 }
  0x29   :  { %450 = shalt.err (!%p447_p4)
}
  0x2a   :  { %s451_s28 = scalar_lea.vmem %s45_s19, 2048  ;;  %p456_p6 = scmp.lt.s32.totalorder %s45_s19, %s45_s19 }
  0x2b   :  { %p452_p5 = scmp.ne.s32.totalorder %s45_s19, %s451_s28  ;;  %p457_p7 = scmp.lt.s32.totalorder %s451_s28, %s451_s28 }
  0x2d   :  { %p458_p8 = por %p457_p7, %p456_p6 }
  0x2f   :  { %p459_p9 = pnand %p458_p8, %p452_p5 }
  0x31   :  { %462 = shalt.err (!%p459_p9)
}
  0x32   :  { %50 = dma.hbm_to_vmem [thread:$0]  %s605_s3, 2048, %s45_s19, [#allocation6], %s493_s30, %s493_s30, %s494_s6  }
  0x33   :  { %485 = dma.done.wait [#allocation3], 256  }
  0x34   :  { %486 = vsyncadd [#allocation3], 4294967040 }
  0x35   :  { %487 = dma.done.wait [#allocation6], 2560  }
  0x36   :  { %488 = vsyncadd [#allocation6], 4294964736  ;;  %vm75_vm0 = vcmask 261120   ;;  %v64_v0 = vld [vmem:[#allocation5] sm:$0xff]  ;;  %v65_v1 = vld [vmem:[#allocation5 + $0x8] sm:$0xff]  ;;  %s496_s9 = smov [#allocation8]  }
  0x37   :  { %v66_v2 = vld [vmem:[#allocation5 + $0x10] sm:$0xff]  ;;  %v351_v3 = vpack.c.bf16 %v65_v1, %v64_v0  ;;  %v67_v4 = vld [vmem:[#allocation5 + $0x18] sm:$0xff]  ;;  %v159_v7 = vld [vmem:[#allocation7] sm:$0xff]  ;;  %s264_s10 = sshll.u32 %s496_s9, 4  ;;  %s265_s10 = int_to_ptr.vmem [resolvable:$true] %s264_s10 }
  0x38   :  { %v62_v5 = vld [vmem:[#allocation2] sm:$0xff]  ;;  %v355_v6 = vpack.c.bf16 %v67_v4, %v66_v2  ;;  %v160_v8 = vld [vmem:[#allocation7 + $0x8] sm:$0xff]  ;;  %v162_v11 = vld [vmem:[#allocation7 + $0x18] sm:$0xff]  ;;  %p468_p11 = scmp.lt.s32.totalorder %s265_s10, %s265_s10 }
  0x39   :  { %313 = vmatprep.mubr.msk.f32.mxu0 %vm75_vm0, %v62_v5  ;;  %v161_v9 = vld [vmem:[#allocation7 + $0x10] sm:$0xff]  ;;  %352 = vmatprep.subr.bf16.mxu0 %v351_v3  ;;  %v359_v10 = vpack.c.bf16 %v160_v8, %v159_v7  ;;  %v163_v13 = vld [vmem:[#allocation7 + $0x20] sm:$0xff]  ;;  %v164_v14 = vld [vmem:[#allocation7 + $0x28] sm:$0xff] }
  0x3a   :  { %354 = vmatpush3.bf16.msra.mxu0 %v351_v3  ;;  %v363_v12 = vpack.c.bf16 %v162_v11, %v161_v9  ;;  %v367_v15 = vpack.c.bf16 %v164_v14, %v163_v13  ;;  %v63_v16 = vld [vmem:[#allocation2 + $0x8] sm:$0xff]  ;;  %v165_v17 = vld [vmem:[#allocation7 + $0x30] sm:$0xff]  ;;  %v167_v20 = vld [vmem:[#allocation7 + $0x40] sm:$0xff] }
  0x3b   :  { %356 = vmatprep.subr.bf16.mxu0 %v355_v6  ;;  %360 = vmatprep.subr.bf16.mxu1 %v359_v10  ;;  %v166_v18 = vld [vmem:[#allocation7 + $0x38] sm:$0xff]  ;;  %v168_v21 = vld [vmem:[#allocation7 + $0x48] sm:$0xff]  ;;  %v169_v23 = vld [vmem:[#allocation7 + $0x50] sm:$0xff] }
  0x3c   :  { %362 = vmatpush3.bf16.msra.mxu1 %v359_v10  ;;  %v371_v19 = vpack.c.bf16 %v166_v18, %v165_v17  ;;  %v375_v22 = vpack.c.bf16 %v168_v21, %v167_v20  ;;  %v170_v24 = vld [vmem:[#allocation7 + $0x58] sm:$0xff]  ;;  %v171_v26 = vld [vmem:[#allocation7 + $0x60] sm:$0xff]  ;;  %v172_v27 = vld [vmem:[#allocation7 + $0x68] sm:$0xff] }
  0x3d   :  { %364 = vmatprep.subr.bf16.mxu1 %v363_v12  ;;  %v379_v25 = vpack.c.bf16 %v170_v24, %v169_v23  ;;  %v383_v28 = vpack.c.bf16 %v172_v27, %v171_v26  ;;  %v173_v29 = vld [vmem:[#allocation7 + $0x70] sm:$0xff]  ;;  %v174_v30 = vld [vmem:[#allocation7 + $0x78] sm:$0xff] }
  0x3e   :  { %358 = vmatpush3.bf16.msra.mxu0 %v355_v6  ;;  %v387_v31 = vpack.c.bf16 %v174_v30, %v173_v29  ;;  %v277_v32 = vld [vmem:[%s604_s2] ss:$0 sm:$0xff]  ;;  %s463_s2 = scalar_lea.vmem %s265_s10, 256 }
  0x3f   :  { %v280_v39 = vld [vmem:[%s606_s4] ss:$0 sm:$0xff]  ;;  %p464_p10 = scmp.ne.s32.totalorder %s265_s10, %s463_s2  ;;  %p469_p12 = scmp.lt.s32.totalorder %s463_s2, %s463_s2 }
  0x40   :  { %366 = vmatpush3.bf16.msra.mxu1 %v363_v12 }
  0x41   :  { %314 = vmatmul.mubr.msk.f32.vlgmr.msra.gmra.mrb[0].mxu0 %vm75_vm0, %v63_v16  ;;  %368 = vmatprep.subr.bf16.mxu1 %v367_v15  ;;  %p470_p13 = por %p469_p12, %p468_p11 }
  0x43   :  { %p471_p0 = pnand %p470_p13, %p464_p10 }
  0x44   :  { %370 = vmatpush3.bf16.msra.mxu1 %v367_v15 }
  0x45   :  { %372 = vmatprep.subr.bf16.mxu1 %v371_v19 }
  0x48   :  { %374 = vmatpush3.bf16.msra.mxu1 %v371_v19 }
  0x49   :  { %376 = vmatprep.subr.bf16.mxu1 %v375_v22 }
  0x4c   :  { %378 = vmatpush3.bf16.msra.mxu1 %v375_v22 }
  0x4d   :  { %380 = vmatprep.subr.bf16.mxu1 %v379_v25 }
  0x50   :  { %382 = vmatpush3.bf16.msra.mxu1 %v379_v25 }
  0x51   :  { %384 = vmatprep.subr.bf16.mxu1 %v383_v28 }
  0x54   :  { %386 = vmatpush3.bf16.msra.mxu1 %v383_v28 }
  0x55   :  { %388 = vmatprep.subr.bf16.mxu1 %v387_v31 }
  0x58   :  { %390 = vmatpush3.bf16.msra.mxu1 %v387_v31 }
 0x114   :  { %v315_v33 = vpop.f32.mrb[0].mxu0 }
 0x115   :  { %v154_v34 = vadd.f32 %v315_v33, %v277_v32  ;;  %v148_v35 = vpop.f32.mrb[1].mxu0 }
 0x116   :  { %v149_v36 = vadd.f32 %v277_v32, %v148_v35 }
 0x117   :  { %v158_v38 = vmax.f32 %v154_v34, 0.0 }
 0x118   :  { %v157_v37 = vmax.f32 %v149_v36, 0.0 }
 0x11a   :  { %348 = vmatprep.mubr.f32.mxu1 %v157_v37 }
 0x11b   :  { %349 = vmatmul.mubr.f32.vlgmr.msra.gmra.mrb[0].mxu1 %v158_v38 }
 0x1ee   :  { %v350_v40 = vpop.f32.mrb[0].mxu1 }
 0x1ef   :  { %v254_v41 = vadd.f32 %v350_v40, %v280_v39  ;;  %v248_v42 = vpop.f32.mrb[1].mxu1 }
 0x1f0   :  { %v249_v43 = vadd.f32 %v280_v39, %v248_v42 }
 0x1f1   :  { %258 = vst [vmem:[#allocation8 + $0x8] sm:$0xff] %v254_v41 }
 0x1f2   :  { %257 = vst [vmem:[#allocation8] sm:$0xff] %v249_v43 }
 0x1f3   :  { %474 = shalt.err (!%p471_p0)
}
 0x1f4   :  { %s475_s4 = scalar_lea.hbm %s607_s5, 256 }
 0x1f5   :  { %p476_p1 = scmp.ne.s32.totalorder %s607_s5, %s475_s4  ;;  %p479_p2 = scmp.lt.u32.totalorder %s475_s4, %s607_s5 }
 0x1f7   :  { %p481_p3 = pnand %p479_p2, %p476_p1 }
 0x1f9   :  { %484 = shalt.err (!%p481_p3)
}
 0x1fa   :  { %270 = dma.vmem_to_hbm [thread:$0]  %s265_s10, 256, %s607_s5, [#allocation4], %s493_s30, %s493_s30, %s494_s6  }
 0x1fb   :  { %489 = dma.done.wait [#allocation4], 256  }
 0x1fc   :  { %490 = vsyncadd [#allocation4], 4294967040 }
 0x1fd   :  { %274 = vsyncpa [#allocation3], 1 }
 0x1fe   :  { %275 = vsyncpa [#allocation6], 1 }
 0x1ff   :  { %276 = vsyncpa [#allocation4], 1 }

</bundles_post_ra>
